<compile_context>
chip_gen: v5e
topology: v5e:2x2
jax: 0.10.0
libtpu: 0.0.40
codegen_flags: <defaults>
</compile_context>

<pallas_src>
import functools

import jax
import jax.numpy as jnp
from jax.experimental import pallas as pl
from jax.experimental.pallas import tpu as pltpu


def _round_up(x, m):
    return ((x + m - 1) // m) * m


def _tile(n, cap, align):
    """Aligned tile size <= cap; prefers >= 2 tiles when the problem spans more than
    one aligned lane group, keeping the 'parallel' grid axis shardable on v7x."""
    n = max(int(n), 1)
    full = _round_up(n, align)
    if full <= align:
        return align
    half = _round_up((n + 1) // 2, align)
    return max(align, min(cap, full, half))


# --------------------------------------------------------------------------------------
# Node classification: softmax cross-entropy partial sums, lane-dense (C, N) layout.
# --------------------------------------------------------------------------------------
def _node_ce_kernel(n_atoms, t_n, logits_ref, labels_ref, out_ref):
    i = pl.program_id(0)                                        # top level only

    logits = logits_ref[...]                                    # (C, tN) f32
    labels = labels_ref[...]                                    # (1, tN) i32

    m = jnp.max(logits, axis=0, keepdims=True)                  # (1, tN) sublane reduce
    lse = jnp.log(jnp.sum(jnp.exp(logits - m), axis=0, keepdims=True)) + m
    cls = jax.lax.broadcasted_iota(jnp.int32, logits.shape, 0)  # (C, tN)
    picked = jnp.sum(jnp.where(cls == labels, logits, 0.0), axis=0, keepdims=True)
    ce = lse - picked                                           # (1, tN)

    col = i * t_n + jax.lax.broadcasted_iota(jnp.int32, (1, t_n), 1)
    out_ref[...] = jnp.where(col < n_atoms, ce, 0.0)[None]      # (1, 1, tN)


# --------------------------------------------------------------------------------------
# Edge classification: chunked squared-cdist running min + single-log BCE partial sums.
# --------------------------------------------------------------------------------------
def _edge_bce_kernel(n_edge_pred, t_ep, t_er, er_chunk, num_er_tiles,
                     ep_ref, er_ref, ecp_ref, out_ref, min_sc):
    i = pl.program_id(0)                                        # top level only
    k = pl.program_id(1)                                        # top level only

    @pl.when(k == 0)
    def _():
        min_sc[...] = jnp.full((1, t_ep), jnp.inf, dtype=jnp.float32)

    ep = ep_ref[...]                                            # (3, tEp) lane-dense
    epx = ep[0:1, :]
    epy = ep[1:2, :]
    epg = ep[2:3, :]                                            # graph id row

    # Chunked reduction over the reference-edge block: live intermediate is only
    # (er_chunk, tEp) (a few vregs), never a full (tEr, tEp) slab.
    running = min_sc[...]                                       # (1, tEp)
    for c in range(t_er // er_chunk):                           # statically unrolled
        er_c = er_ref[pl.ds(c * er_chunk, er_chunk), :]         # (er_chunk, 3)
        dx = epx - er_c[:, 0:1]
        dy = epy - er_c[:, 1:2]
        dg = epg - er_c[:, 2:3]
        d2 = dx * dx + dy * dy + dg * dg                        # (er_chunk, tEp)
        running = jnp.minimum(running, jnp.min(d2, axis=0, keepdims=True))
    min_sc[...] = running

    lane = i * t_ep + jax.lax.broadcasted_iota(jnp.int32, (1, t_ep), 1)
    valid = lane < n_edge_pred

    @pl.when(k == num_er_tiles - 1)                             # static Python constant
    def _():
        # sqrt(min d2) < 1e-3  <=>  min d2 < 1e-6 (no sqrt).
        matched = running < 1.0e-6
        p = ecp_ref[...]                                        # (1, tEp)
        # PyTorch nn.BCELoss: -(y log p + (1-y) log(1-p)), log clamped at -100.
        bce = -jnp.maximum(jnp.log(jnp.where(matched, p, 1.0 - p)), -100.0)
        out_ref[...] = jnp.where(valid, bce, 0.0)[None]         # (1, 1, tEp)


# --------------------------------------------------------------------------------------
# Wrapper: GraphLoss.forward
# --------------------------------------------------------------------------------------
def graph_loss(pred, ref, node_factor=1.0, edge_factor=1.0, separate_loss_factors=False):
    """JAX/Pallas equivalent of GraphLoss.forward.

    pred = (node_logits: list[(n_atoms_i, n_classes)],
            edge_probs:  list[(n_cand_i,)],
            edges_pred:  list[(2, n_cand_i)])
    ref  = (node_labels: list[(n_atoms_i,)],
            edges_ref:   list[(2, n_edges_i)])
    """
    node_classes_pred, edge_classes_pred, edges_pred = pred
    node_classes_ref, edges_ref = ref
    assert (len(node_classes_pred) == len(node_classes_ref) == len(edge_classes_pred)
            == len(edges_pred) == len(edges_ref))

    # ---------------- node path ----------------
    logits = jnp.concatenate(node_classes_pred, axis=0).astype(jnp.float32)   # (N, C)
    labels = jnp.concatenate(node_classes_ref, axis=0).astype(jnp.int32)      # (N,)
    n_atoms, n_classes = logits.shape

    t_n = _tile(n_atoms, 2048, 128)
    n_pad = _round_up(n_atoms, t_n)
    num_n_tiles = n_pad // t_n

    # Lane-dense (C, N) layout; padded atom columns are masked in-kernel.
    logits_t = jnp.pad(logits.T, ((0, 0), (0, n_pad - n_atoms)))              # (C, n_pad)
    labels_p = jnp.pad(labels[None, :], ((0, 0), (0, n_pad - n_atoms)))       # (1, n_pad)

    node_partials = pl.pallas_call(
        functools.partial(_node_ce_kernel, n_atoms, t_n),
        out_shape=jax.ShapeDtypeStruct((num_n_tiles, 1, t_n), jnp.float32),
        grid_spec=pltpu.PrefetchScalarGridSpec(
            num_scalar_prefetch=0,
            grid=(num_n_tiles,),
            in_specs=[pl.BlockSpec((n_classes, t_n), lambda i: (0, i)),
                      pl.BlockSpec((1, t_n), lambda i: (0, i))],
            out_specs=pl.BlockSpec((1, 1, t_n), lambda i: (i, 0, 0))),
        compiler_params=pltpu.CompilerParams(dimension_semantics=("parallel",)),
        cost_estimate=pl.CostEstimate(
            flops=int(8 * n_pad * n_classes),
            transcendentals=int(n_pad * (n_classes + 1)),
            bytes_accessed=int(4 * (logits_t.size + labels_p.size + num_n_tiles * t_n))),
    )(logits_t, labels_p)
    node_loss = jnp.sum(node_partials) * jnp.float32(1.0 / n_atoms)

    # ---------------- edge path ----------------
    # Per-graph edges are concatenated; the graph index is carried as an explicit third
    # coordinate, so edges from different graphs always have squared distance >= 1 and
    # can never match (exact for arbitrarily large batches; no float-offset tricks).
    # Graphs with ZERO reference edges are skipped entirely (their candidate edges do
    # not enter the BCE), matching the intent of PyTorch's `er.size(0) > 0` branch.
    ep_rows, er_rows, ecp_rows = [], [], []
    for gid, (ecp, ep, er) in enumerate(zip(edge_classes_pred, edges_pred, edges_ref)):
        if er.size > 0:                                          # reference edges exist
            ncand = ep.shape[1]
            nref = er.shape[1]
            ep_rows.append(jnp.concatenate(
                [ep.astype(jnp.float32),
                 jnp.full((1, ncand), float(gid), jnp.float32)], axis=0))     # (3, ncand)
            er_rows.append(jnp.concatenate(
                [er.T.astype(jnp.float32),
                 jnp.full((nref, 1), float(gid), jnp.float32)], axis=1))      # (nref, 3)
            ecp_rows.append(ecp.astype(jnp.float32)[None, :])                 # (1, ncand)

    have_edges = len(er_rows) > 0
    if have_edges:
        ep_all = jnp.concatenate(ep_rows, axis=1)                 # (3, Ep)
        er_all = jnp.concatenate(er_rows, axis=0)                 # (Er, 3)
        ecp_all = jnp.concatenate(ecp_rows, axis=1)               # (1, Ep)
        n_edge_pred = ep_all.shape[1]
        n_edge_ref = er_all.shape[0]
        if n_edge_pred == 0:
            # TODO(synk): PyTorch would produce NaN here (mean over empty); we return 0.
            have_edges = False

    if have_edges:
        t_ep = _tile(n_edge_pred, 2048, 128)                      # parallel axis
        ep_pad = _round_up(n_edge_pred, t_ep)
        num_ep_tiles = ep_pad // t_ep

        t_er = min(512, _round_up(n_edge_ref, 8))                 # reduction block
        er_pad = _round_up(n_edge_ref, t_er)
        num_er_tiles = er_pad // t_er
        er_chunk = 8                                              # in-kernel sub-slice

        # Padded candidates are masked out of the sum; padded references (graph id -1)
        # can never match a real candidate (graph ids >= 0 -> d2 >= 1).
        ep_p = jnp.pad(ep_all, ((0, 0), (0, ep_pad - n_edge_pred)), constant_values=-1.0)
        er_p = jnp.pad(er_all, ((0, er_pad - n_edge_ref), (0, 0)), constant_values=-1.0)
        ecp_p = jnp.pad(ecp_all, ((0, 0), (0, ep_pad - n_edge_pred)),
                        constant_values=0.5)

        edge_partials = pl.pallas_call(
            functools.partial(_edge_bce_kernel, n_edge_pred, t_ep, t_er, er_chunk,
                              num_er_tiles),
            out_shape=jax.ShapeDtypeStruct((num_ep_tiles, 1, t_ep), jnp.float32),
            grid_spec=pltpu.PrefetchScalarGridSpec(
                num_scalar_prefetch=0,
                grid=(num_ep_tiles, num_er_tiles),                # reduction axis last
                in_specs=[pl.BlockSpec((3, t_ep), lambda i, k: (0, i)),
                          pl.BlockSpec((t_er, 3), lambda i, k: (k, 0)),
                          pl.BlockSpec((1, t_ep), lambda i, k: (0, i))],
                out_specs=pl.BlockSpec((1, 1, t_ep), lambda i, k: (i, 0, 0)),
                scratch_shapes=[pltpu.VMEM((1, t_ep), jnp.float32)]),
            compiler_params=pltpu.CompilerParams(
                dimension_semantics=("parallel", "arbitrary")),
            cost_estimate=pl.CostEstimate(
                flops=int(9 * ep_pad * er_pad + 4 * ep_pad),
                transcendentals=int(ep_pad),
                bytes_accessed=int(4 * (ep_p.size + num_ep_tiles * er_p.size
                                        + ecp_p.size + num_ep_tiles * t_ep))),
        )(ep_p, er_p, ecp_p)
        edge_loss = jnp.sum(edge_partials) * jnp.float32(1.0 / n_edge_pred)
    else:
        edge_loss = jnp.float32(0.0)

    loss = node_factor * node_loss + edge_factor * edge_loss
    if separate_loss_factors:
        return [loss, node_loss, edge_loss]
    return loss


# --------------------------------------------------------------------------------------
# Plain-JAX reference mirroring the PyTorch module, for a correctness check.
# --------------------------------------------------------------------------------------
def _reference_loss(pred, ref, node_factor=1.0, edge_factor=1.0):
    ncp, ecp_l, ep_l = pred
    ncr, er_l = ref
    logits = jnp.concatenate(ncp).astype(jnp.float32)
    labels = jnp.concatenate(ncr)
    lse = jax.scipy.special.logsumexp(logits, axis=-1)
    picked = jnp.take_along_axis(logits, labels[:, None], axis=1)[:, 0]
    node_loss = jnp.mean(lse - picked)
    edge_losses = []
    for ecp, ep, er in zip(ecp_l, ep_l, er_l):
        if er.size > 0:
            a = ep.T.astype(jnp.float32)
            b = er.T.astype(jnp.float32)
            d = jnp.sqrt(jnp.sum((a[:, None, :] - b[None, :, :]) ** 2, axis=-1))
            ecr = (d.min(axis=1) < 1e-3).astype(jnp.float32)
            p = ecp.astype(jnp.float32)
            log_p = jnp.maximum(jnp.log(p), -100.0)
            log_1mp = jnp.maximum(jnp.log(1.0 - p), -100.0)
            edge_losses.append(-(ecr * log_p + (1 - ecr) * log_1mp))
    edge_loss = jnp.concatenate(edge_losses).mean() if edge_losses else jnp.float32(0.0)
    return (node_factor * node_loss + edge_factor * edge_loss, node_loss, edge_loss)


if __name__ == "__main__":
    key = jax.random.PRNGKey(0)
    k1, k2, k3, k4, k5, k6, k7 = jax.random.split(key, 7)

    n_classes = 4
    # Graph 0: 5 atoms, 3 reference edges, 6 candidate edges.
    # Graph 1: 3 atoms, 1 reference edge,  3 candidate edges.
    # Graph 2: 2 atoms, 0 reference edges, 2 candidate edges (skipped by edge loss).
    node_logits = [
        jax.random.normal(k1, (5, n_classes), dtype=jnp.float32),
        jax.random.normal(k2, (3, n_classes), dtype=jnp.float32),
        jax.random.normal(k6, (2, n_classes), dtype=jnp.float32),
    ]
    node_labels = [
        jax.random.randint(k3, (5,), 0, n_classes, dtype=jnp.int32),
        jax.random.randint(k4, (3,), 0, n_classes, dtype=jnp.int32),
        jax.random.randint(k7, (2,), 0, n_classes, dtype=jnp.int32),
    ]
    edges_pred = [
        jnp.array([[0, 0, 0, 1, 1, 2],
                   [1, 2, 3, 2, 3, 3]], dtype=jnp.int32),   # (2, 6)
        jnp.array([[0, 0, 1],
                   [1, 2, 2]], dtype=jnp.int32),            # (2, 3)
        jnp.array([[0, 0],
                   [1, 1]], dtype=jnp.int32),               # (2, 2)
    ]
    edges_ref = [
        jnp.array([[0, 1, 0],
                   [1, 2, 3]], dtype=jnp.int32),            # (2, 3)
        jnp.array([[0],
                   [1]], dtype=jnp.int32),                  # (2, 1)
        jnp.zeros((2, 0), dtype=jnp.int32),                 # (2, 0) -> no ref edges
    ]
    ecp0, ecp1 = jax.random.split(k5)
    edge_probs = [
        jax.random.uniform(ecp0, (6,), minval=0.05, maxval=0.95, dtype=jnp.float32),
        jax.random.uniform(ecp1, (3,), minval=0.05, maxval=0.95, dtype=jnp.float32),
        jnp.full((2,), 0.3, dtype=jnp.float32),
    ]

    pred = (node_logits, edge_probs, edges_pred)
    ref = (node_labels, edges_ref)

    loss, node_loss, edge_loss = graph_loss(pred, ref, node_factor=1.0, edge_factor=1.0,
                                            separate_loss_factors=True)
    loss = jax.block_until_ready(loss)

    ref_loss, ref_node, ref_edge = _reference_loss(pred, ref)
    assert jnp.allclose(node_loss, ref_node, rtol=1e-5, atol=1e-5), (node_loss, ref_node)
    assert jnp.allclose(edge_loss, ref_edge, rtol=1e-5, atol=1e-5), (edge_loss, ref_edge)
    assert jnp.allclose(loss, ref_loss, rtol=1e-5, atol=1e-5), (loss, ref_loss)
    print("KERNEL_OK")
</pallas_src>

<mosaic_0001>
module attributes {stable_mosaic.version = 11 : i64} {
  func.func @_node_ce_kernel(%arg0: i32, %arg1: memref<4x128xf32, #tpu.memory_space<vmem>>, %arg2: memref<1x128xi32, #tpu.memory_space<vmem>>, %arg3: memref<1x1x128xf32, #tpu.memory_space<vmem>>) attributes {dimension_semantics = [#tpu.dimension_semantics<parallel>], iteration_bounds = array<i64: 1>, scalar_prefetch = 0 : i64, scratch_operands = 0 : i64, tpu.core_type = #tpu.core_type<tc>, window_params = [{transform_indices = @transform_0, window_bounds = array<i64: 4, 128>}, {transform_indices = @transform_1, window_bounds = array<i64: 1, 128>}, {transform_indices = @transform_2, window_bounds = array<i64: 1, 1, 128>}]} {
    %c0 = arith.constant 0 : index
    %c0_0 = arith.constant 0 : index
    %0 = vector.load %arg1[%c0, %c0_0] : memref<4x128xf32, #tpu.memory_space<vmem>>, vector<4x128xf32>
    %c0_1 = arith.constant 0 : index
    %c0_2 = arith.constant 0 : index
    %1 = vector.load %arg2[%c0_1, %c0_2] : memref<1x128xi32, #tpu.memory_space<vmem>>, vector<1x128xi32>
    %cst = arith.constant dense<0xFF800000> : vector<128xf32>
    %2 = vector.multi_reduction <maximumf>, %0, %cst [0] : vector<4x128xf32> to vector<128xf32>
    %3 = vector.shape_cast %2 : vector<128xf32> to vector<1x128xf32>
    %4 = vector.broadcast %3 : vector<1x128xf32> to vector<4x128xf32>
    %5 = arith.subf %0, %4 : vector<4x128xf32>
    %6 = math.exp %5 : vector<4x128xf32>
    %cst_3 = arith.constant dense<0.000000e+00> : vector<128xf32>
    %7 = vector.multi_reduction <add>, %6, %cst_3 [0] : vector<4x128xf32> to vector<128xf32>
    %8 = vector.shape_cast %7 : vector<128xf32> to vector<1x128xf32>
    %9 = math.log %8 : vector<1x128xf32>
    %10 = arith.addf %9, %3 : vector<1x128xf32>
    %11 = tpu.iota {dimensions = array<i32: 0>} : vector<4x128xi32>
    %12 = vector.broadcast %1 : vector<1x128xi32> to vector<4x128xi32>
    %13 = arith.cmpi eq, %11, %12 : vector<4x128xi32>
    %cst_4 = arith.constant 0.000000e+00 : f32
    %14 = vector.broadcast %cst_4 : f32 to vector<4x128xf32>
    %15 = arith.select %13, %0, %14 : vector<4x128xi1>, vector<4x128xf32>
    %cst_5 = arith.constant dense<0.000000e+00> : vector<128xf32>
    %16 = vector.multi_reduction <add>, %15, %cst_5 [0] : vector<4x128xf32> to vector<128xf32>
    %17 = vector.shape_cast %16 : vector<128xf32> to vector<1x128xf32>
    %18 = arith.subf %10, %17 : vector<1x128xf32>
    %c128_i32 = arith.constant 128 : i32
    %19 = arith.muli %arg0, %c128_i32 : i32
    %20 = tpu.iota {dimensions = array<i32: 1>} : vector<1x128xi32>
    %21 = vector.broadcast %19 : i32 to vector<1x128xi32>
    %22 = arith.addi %21, %20 : vector<1x128xi32>
    %c10_i32 = arith.constant 10 : i32
    %23 = vector.broadcast %c10_i32 : i32 to vector<1x128xi32>
    %24 = arith.cmpi slt, %22, %23 : vector<1x128xi32>
    %cst_6 = arith.constant 0.000000e+00 : f32
    %25 = vector.broadcast %cst_6 : f32 to vector<1x128xf32>
    %26 = arith.select %24, %18, %25 : vector<1x128xi1>, vector<1x128xf32>
    %27 = vector.shape_cast %26 : vector<1x128xf32> to vector<1x1x128xf32>
    %c0_7 = arith.constant 0 : index
    %c0_8 = arith.constant 0 : index
    %c0_9 = arith.constant 0 : index
    %28 = vector.load %arg3[%c0_7, %c0_8, %c0_9] : memref<1x1x128xf32, #tpu.memory_space<vmem>>, vector<1x1x128xf32>
    tpu.vector_store %arg3[%c0_7, %c0_8, %c0_9], %27 {strides = array<i32>} : memref<1x1x128xf32, #tpu.memory_space<vmem>>, vector<1x1x128xf32>,
    return
  }
  func.func @transform_0(%arg0: i32) -> (i32, i32) {
    %c0_i32 = arith.constant 0 : i32
    %c0_i32_0 = arith.constant 0 : i32
    return %c0_i32, %arg0 : i32, i32
  }
  func.func @transform_1(%arg0: i32) -> (i32, i32) {
    %c0_i32 = arith.constant 0 : i32
    %c0_i32_0 = arith.constant 0 : i32
    return %c0_i32, %arg0 : i32, i32
  }
  func.func @transform_2(%arg0: i32) -> (i32, i32, i32) {
    %c0_i32 = arith.constant 0 : i32
    %c0_i32_0 = arith.constant 0 : i32
    %c0_i32_1 = arith.constant 0 : i32
    return %arg0, %c0_i32, %c0_i32_0 : i32, i32, i32
  }
}

</mosaic_0001>

<bundles_post_ra>
// kernel: tpu_custom_call.1
= control target key start
LH: loop header
LB: loop body
LE: loop exit
PB: predicated region body
PF: predicated region fallthrough
CT: control target
= control target key end

     0   :  { %7 = vsyncpa [#allocation3], 0  ;;  %s218_s0 = inlined_call_operand.hbm [shape: f32[4,128], index: 0, kind: input, shape index: {}]   ;;  %s219_s1 = inlined_call_operand.hbm [shape: s32[1,128], index: 1, kind: input, shape index: {}]   ;;  %s220_s2 = inlined_call_operand.hbm [shape: f32[1,1,128], index: 2, kind: output, shape index: {}]  }
   0x1   :  { %8 = vsyncpa [#allocation6], 0 }
   0x2   :  { %9 = vsyncpa [#allocation4], 0  ;;  %s15_s11 = sshll.u32 %s218_s0, 4  ;;  %s188_s12 = smov [#allocation2]   ;;  %s16_s11 = int_to_ptr.hbm [resolvable:$true] %s15_s11 }
   0x3   :  { %s17_s13 = sshll.u32 %s188_s12, 4  ;;  %s26_s16 = sshll.u32 %s219_s1, 4  ;;  %s18_s13 = int_to_ptr.vmem [resolvable:$true] %s17_s13  ;;  %s27_s16 = int_to_ptr.hbm [resolvable:$true] %s26_s16 }
   0x4   :  { %20 = dma.hbm_to_vmem [thread:$0]  %s16_s11, 64, %s18_s13, [#allocation3]  }
   0x5   :  { %s189_s17 = smov [#allocation5]  }
   0x6   :  { %s28_s18 = sshll.u32 %s189_s17, 4  ;;  %s29_s18 = int_to_ptr.vmem [resolvable:$true] %s28_s18 }
   0x7   :  { %31 = dma.hbm_to_vmem [thread:$0]  %s27_s16, 16, %s29_s18, [#allocation6]  }
   0x8   :  { %182 = dma.done.wait [#allocation3], 64  }
   0x9   :  { %183 = vsyncadd [#allocation3], 4294967232 }
   0xa   :  { %184 = dma.done.wait [#allocation6], 16  }
   0xb   :  { %185 = vsyncadd [#allocation6], 4294967280  ;;  %vm42_vm0 = vcmask 1043456   ;;  %v40_v0 = vld [vmem:[#allocation2] sm:$0xf]  ;;  %v63_v6 = vlaneseq  ;;  %s190_s0 = smov [#allocation7]  }
   0xc   :  { %v43_v1 = vsel %vm42_vm0, %v40_v0, -inf  ;;  %v105_v10 = vld [vmem:[#allocation5] ss:$0 sm:$0xff]  ;;  %s89_s1 = sshll.u32 %s190_s0, 4  ;;  %s91_s21 = sshll.u32 %s220_s2, 4  ;;  %s90_s1 = int_to_ptr.vmem [resolvable:$true] %s89_s1  ;;  %s92_s21 = int_to_ptr.hbm [resolvable:$true] %s91_s21 }
   0xd   :  { %v44_v2 = vrot.slane %v43_v1, 4  ;;  %v64_v9 = vshrl.u32 %v63_v6, 7  ;;  %v78_v29 = vand.u32 127, %v63_v6 }
   0xf   :  { %v45_v3 = vmax.f32 %v43_v1, %v44_v2  ;;  %vm66_vm1 = vcmp.eq.s32.totalorder %v64_v9, %v105_v10  ;;  %vm81_vm2 = vcmp.lt.s32.totalorder %v78_v29, 10 }
  0x10   :  { %v67_v13 = vsel %vm66_vm1, %v40_v0, 0.0 }
  0x11   :  { %v46_v4 = vrot.slane %v45_v3, 2  ;;  %v68_v14 = vsel %vm42_vm0, %v67_v13, 0.0 }
  0x12   :  { %v69_v17 = vrot.slane %v68_v14, 4 }
  0x13   :  { %v47_v5 = vmax.f32 %v45_v3, %v46_v4 }
  0x14   :  { %v70_v20 = vadd.f32 %v69_v17, %v68_v14 }
  0x15   :  { %v48_v7 = vrot.slane %v47_v5, 1 }
  0x16   :  { %v71_v23 = vrot.slane %v70_v20, 2 }
  0x17   :  { %v49_v8 = vmax.f32 %v47_v5, %v48_v7 }
  0x18   :  { %v72_v26 = vadd.f32 %v71_v23, %v70_v20 }
  0x19   :  { %v50_v11 = vsub.f32 %v40_v0, %v49_v8 }
  0x1a   :  { %v73_v27 = vrot.slane %v72_v26, 1 }
  0x1b   :  { %v51_v12 = vmul.f32 1.442695, %v50_v11 }
  0x1c   :  { %v74_v31 = vadd.f32 %v73_v27, %v72_v26 }
  0x1d   :  { %106 = vpow2.f32 %v51_v12 }
  0x23   :  { %v107_v15 = vpop.eup %106 }
  0x24   :  { %v53_v16 = vsel %vm42_vm0, %v107_v15, 0.0 }
  0x25   :  { %v54_v18 = vrot.slane %v53_v16, 4 }
  0x27   :  { %v55_v19 = vadd.f32 %v54_v18, %v53_v16 }
  0x29   :  { %v56_v21 = vrot.slane %v55_v19, 2 }
  0x2b   :  { %v57_v22 = vadd.f32 %v56_v21, %v55_v19 }
  0x2d   :  { %v58_v24 = vrot.slane %v57_v22, 1 }
  0x2f   :  { %v59_v25 = vadd.f32 %v58_v24, %v57_v22 }
  0x31   :  { %108 = vlog2.f32 %v59_v25 }
  0x37   :  { %v109_v28 = vpop.eup %108 }
  0x38   :  { %v61_v30 = vmul.f32 0.6931472, %v109_v28 }
  0x3a   :  { %v62_v32 = vadd.f32 %v61_v30, %v49_v8 }
  0x3c   :  { %v75_v33 = vsub.f32 %v62_v32, %v74_v31 }
  0x3e   :  { %v82_v34 = vsel %vm81_vm2, %v75_v33, 0.0 }
  0x3f   :  { %83 = vst [vmem:[#allocation7] sm:$0x1] %v82_v34 }
  0x40   :  { %94 = dma.vmem_to_hbm [thread:$0]  %s90_s1, 16, %s92_s21, [#allocation4]  }
  0x41   :  { %186 = dma.done.wait [#allocation4], 16  }
  0x42   :  { %187 = vsyncadd [#allocation4], 4294967280 }
  0x43   :  { %99 = vsyncpa [#allocation3], 1 }
  0x44   :  { %100 = vsyncpa [#allocation6], 1 }
  0x45   :  { %101 = vsyncpa [#allocation4], 1 }

</bundles_post_ra>
